<compile_context>
chip_gen: v5e
topology: v5e:2x2
jax: 0.10.0
libtpu: 0.0.40
codegen_flags: <defaults>
</compile_context>

<pallas_src>
import math
import functools

import jax
import jax.numpy as jnp
from jax import lax
from jax.experimental import pallas as pl
from jax.experimental.pallas import tpu as pltpu


# ----------------------------------------------------------------------------
# Kernel
# ----------------------------------------------------------------------------

def _embedding_gather_kernel(ids_ref, table_ref, out_ref, *, scale, tile):
    """One grid step: gather `tile` rows from the resident table and scale.

    ids_ref:   (Np,)   int32  SMEM   all token ids (scalar-prefetched)
    table_ref: (V, D)  float  VMEM   full embedding table (same block every step)
    out_ref:   (tile, D) float VMEM  scaled embedding rows for this tile
    """
    base = pl.program_id(0) * tile

    def body(t, carry):
        # Dynamic row read from the VMEM-resident table (no MXU, no one-hot).
        # Note: out-of-range ids are not checked (PyTorch nn.Embedding would
        # raise); callers must pass ids in [0, vocab).
        row = table_ref[ids_ref[base + t], :]                  # (D,)
        out_ref[t, :] = (row * scale).astype(out_ref.dtype)
        return carry

    lax.fori_loop(0, tile, body, 0, unroll=True)


# ----------------------------------------------------------------------------
# Wrapper
# ----------------------------------------------------------------------------

def _pick_tile(n, max_tile):
    """Sublane-aligned token tile; prefer one that divides n (no tail slice)."""
    if n <= 8:
        return n, 0
    t = max(8, (min(max_tile, n) // 8) * 8)
    for cand in range(t, 7, -8):
        if n % cand == 0:
            return cand, 0
    return t, (-n) % t          # fall back to padding


def embedding_lookup(tokens, table, *, token_tile=256):
    """EmbeddingLayer.forward: table[tokens] * sqrt(d_model).

    tokens: int array of any shape (e.g. (B, S))
    table:  (vocab, d_model) float array
    returns tokens.shape + (d_model,)
    """
    V, D = table.shape
    orig_shape = tokens.shape

    ids = tokens.reshape(-1).astype(jnp.int32)
    N = ids.shape[0]

    T, n_pad = _pick_tile(N, token_tile)
    if n_pad:
        ids = jnp.pad(ids, (0, n_pad))      # padded ids gather row 0; sliced off
    Np = ids.shape[0]

    scale = math.sqrt(D)
    grid = (Np // T,)

    # Explicit VMEM budget: table (double-buffered by default BlockSpec
    # pipelining) + output tiles (double-buffered) + slack.
    itemsize = jnp.dtype(table.dtype).itemsize
    vmem_limit = int(2 * V * D * itemsize + 4 * T * D * itemsize + (2 << 20))
    vmem_limit = max(8 * 1024 * 1024, min(vmem_limit, 64 * 1024 * 1024))

    out = pl.pallas_call(
        functools.partial(_embedding_gather_kernel, scale=scale, tile=T),
        out_shape=jax.ShapeDtypeStruct((Np, D), table.dtype),
        grid_spec=pltpu.PrefetchScalarGridSpec(
            num_scalar_prefetch=1,          # ids -> SMEM, passed to index_maps
            grid=grid,
            in_specs=[
                # Full table, same block every step -> DMA'd once, VMEM-resident.
                pl.BlockSpec((V, D), lambda i, ids: (0, 0)),
            ],
            out_specs=pl.BlockSpec((T, D), lambda i, ids: (i, 0)),
        ),
        compiler_params=pltpu.CompilerParams(
            dimension_semantics=("parallel",),
            vmem_limit_bytes=vmem_limit,
        ),
    )(ids, table)

    if n_pad:
        out = out[:N]
    return out.reshape(*orig_shape, D)


# ----------------------------------------------------------------------------
# Main
# ----------------------------------------------------------------------------

if __name__ == "__main__":
    B, S = 2, 8
    VOCAB, D_MODEL = 256, 128        # lane-dense d_model (multiple of 128)

    root = jax.random.PRNGKey(0)
    k_tok, k_tab = jax.random.split(root)

    tokens = jax.random.randint(k_tok, (B, S), 0, VOCAB, dtype=jnp.int32)
    table = jax.random.normal(k_tab, (VOCAB, D_MODEL), jnp.float32) * 0.02

    # token_tile=8 at this toy size -> T=8 (divides B*S=16), grid=(2,),
    # exercising the tiled pipeline with no tail padding / output slice.
    fwd = jax.jit(functools.partial(embedding_lookup, token_tile=8))
    out = jax.block_until_ready(fwd(tokens, table))

    # Pure-JAX reference of the PyTorch module's forward.
    ref = table[tokens] * math.sqrt(D_MODEL)

    assert out.shape == (B, S, D_MODEL)
    assert bool(jnp.all(jnp.isfinite(out)))
    assert bool(jnp.allclose(out, ref, atol=1e-5, rtol=1e-5))
    print("KERNEL_OK")
</pallas_src>

<mosaic_0001>
module attributes {stable_mosaic.version = 11 : i64} {
  func.func @_embedding_gather_kernel(%arg0: i32, %arg1: memref<16xi32, #tpu.memory_space<smem>>, %arg2: memref<256x128xf32, #tpu.memory_space<vmem>>, %arg3: memref<8x128xf32, #tpu.memory_space<vmem>>) attributes {dimension_semantics = [#tpu.dimension_semantics<parallel>], iteration_bounds = array<i64: 2>, scalar_prefetch = 1 : i64, scratch_operands = 0 : i64, tpu.core_type = #tpu.core_type<tc>, window_params = [{pipeline_mode = #tpu.pipeline_mode<synchronous>, transform_indices = @transform_0, window_bounds = array<i64: 256, 128>}, {transform_indices = @transform_1, window_bounds = array<i64: 8, 128>}]} {
    %c8_i32 = arith.constant 8 : i32
    %0 = arith.muli %arg0, %c8_i32 : i32
    %c0_i32 = arith.constant 0 : i32
    %1 = arith.addi %0, %c0_i32 : i32
    %2 = arith.index_cast %1 : i32 to index
    %3 = memref.load %arg1[%2] : memref<16xi32, #tpu.memory_space<smem>>
    %4 = arith.index_cast %3 : i32 to index
    %c0 = arith.constant 0 : index
    %5 = vector.load %arg2[%4, %c0] : memref<256x128xf32, #tpu.memory_space<vmem>>, vector<1x128xf32>
    %6 = vector.shape_cast %5 : vector<1x128xf32> to vector<128xf32>
    %cst = arith.constant 11.3137083 : f32
    %7 = vector.broadcast %cst : f32 to vector<128xf32>
    %8 = arith.mulf %6, %7 : vector<128xf32>
    %9 = arith.index_cast %c0_i32 : i32 to index
    %c0_0 = arith.constant 0 : index
    %10 = vector.load %arg3[%9, %c0_0] : memref<8x128xf32, #tpu.memory_space<vmem>>, vector<1x128xf32>
    %11 = vector.shape_cast %10 : vector<1x128xf32> to vector<128xf32>
    %12 = vector.shape_cast %8 : vector<128xf32> to vector<1x128xf32>
    tpu.vector_store %arg3[%9, %c0_0], %12 {strides = array<i32>} : memref<8x128xf32, #tpu.memory_space<vmem>>, vector<1x128xf32>,
    %c1_i32 = arith.constant 1 : i32
    %13 = arith.addi %0, %c1_i32 : i32
    %14 = arith.index_cast %13 : i32 to index
    %15 = memref.load %arg1[%14] : memref<16xi32, #tpu.memory_space<smem>>
    %16 = arith.index_cast %15 : i32 to index
    %c0_1 = arith.constant 0 : index
    %17 = vector.load %arg2[%16, %c0_1] : memref<256x128xf32, #tpu.memory_space<vmem>>, vector<1x128xf32>
    %18 = vector.shape_cast %17 : vector<1x128xf32> to vector<128xf32>
    %cst_2 = arith.constant 11.3137083 : f32
    %19 = vector.broadcast %cst_2 : f32 to vector<128xf32>
    %20 = arith.mulf %18, %19 : vector<128xf32>
    %21 = arith.index_cast %c1_i32 : i32 to index
    %c0_3 = arith.constant 0 : index
    %22 = vector.load %arg3[%21, %c0_3] : memref<8x128xf32, #tpu.memory_space<vmem>>, vector<1x128xf32>
    %23 = vector.shape_cast %22 : vector<1x128xf32> to vector<128xf32>
    %24 = vector.shape_cast %20 : vector<128xf32> to vector<1x128xf32>
    tpu.vector_store %arg3[%21, %c0_3], %24 {strides = array<i32>} : memref<8x128xf32, #tpu.memory_space<vmem>>, vector<1x128xf32>,
    %c2_i32 = arith.constant 2 : i32
    %25 = arith.addi %0, %c2_i32 : i32
    %26 = arith.index_cast %25 : i32 to index
    %27 = memref.load %arg1[%26] : memref<16xi32, #tpu.memory_space<smem>>
    %28 = arith.index_cast %27 : i32 to index
    %c0_4 = arith.constant 0 : index
    %29 = vector.load %arg2[%28, %c0_4] : memref<256x128xf32, #tpu.memory_space<vmem>>, vector<1x128xf32>
    %30 = vector.shape_cast %29 : vector<1x128xf32> to vector<128xf32>
    %cst_5 = arith.constant 11.3137083 : f32
    %31 = vector.broadcast %cst_5 : f32 to vector<128xf32>
    %32 = arith.mulf %30, %31 : vector<128xf32>
    %33 = arith.index_cast %c2_i32 : i32 to index
    %c0_6 = arith.constant 0 : index
    %34 = vector.load %arg3[%33, %c0_6] : memref<8x128xf32, #tpu.memory_space<vmem>>, vector<1x128xf32>
    %35 = vector.shape_cast %34 : vector<1x128xf32> to vector<128xf32>
    %36 = vector.shape_cast %32 : vector<128xf32> to vector<1x128xf32>
    tpu.vector_store %arg3[%33, %c0_6], %36 {strides = array<i32>} : memref<8x128xf32, #tpu.memory_space<vmem>>, vector<1x128xf32>,
    %c3_i32 = arith.constant 3 : i32
    %37 = arith.addi %0, %c3_i32 : i32
    %38 = arith.index_cast %37 : i32 to index
    %39 = memref.load %arg1[%38] : memref<16xi32, #tpu.memory_space<smem>>
    %40 = arith.index_cast %39 : i32 to index
    %c0_7 = arith.constant 0 : index
    %41 = vector.load %arg2[%40, %c0_7] : memref<256x128xf32, #tpu.memory_space<vmem>>, vector<1x128xf32>
    %42 = vector.shape_cast %41 : vector<1x128xf32> to vector<128xf32>
    %cst_8 = arith.constant 11.3137083 : f32
    %43 = vector.broadcast %cst_8 : f32 to vector<128xf32>
    %44 = arith.mulf %42, %43 : vector<128xf32>
    %45 = arith.index_cast %c3_i32 : i32 to index
    %c0_9 = arith.constant 0 : index
    %46 = vector.load %arg3[%45, %c0_9] : memref<8x128xf32, #tpu.memory_space<vmem>>, vector<1x128xf32>
    %47 = vector.shape_cast %46 : vector<1x128xf32> to vector<128xf32>
    %48 = vector.shape_cast %44 : vector<128xf32> to vector<1x128xf32>
    tpu.vector_store %arg3[%45, %c0_9], %48 {strides = array<i32>} : memref<8x128xf32, #tpu.memory_space<vmem>>, vector<1x128xf32>,
    %c4_i32 = arith.constant 4 : i32
    %49 = arith.addi %0, %c4_i32 : i32
    %50 = arith.index_cast %49 : i32 to index
    %51 = memref.load %arg1[%50] : memref<16xi32, #tpu.memory_space<smem>>
    %52 = arith.index_cast %51 : i32 to index
    %c0_10 = arith.constant 0 : index
    %53 = vector.load %arg2[%52, %c0_10] : memref<256x128xf32, #tpu.memory_space<vmem>>, vector<1x128xf32>
    %54 = vector.shape_cast %53 : vector<1x128xf32> to vector<128xf32>
    %cst_11 = arith.constant 11.3137083 : f32
    %55 = vector.broadcast %cst_11 : f32 to vector<128xf32>
    %56 = arith.mulf %54, %55 : vector<128xf32>
    %57 = arith.index_cast %c4_i32 : i32 to index
    %c0_12 = arith.constant 0 : index
    %58 = vector.load %arg3[%57, %c0_12] : memref<8x128xf32, #tpu.memory_space<vmem>>, vector<1x128xf32>
    %59 = vector.shape_cast %58 : vector<1x128xf32> to vector<128xf32>
    %60 = vector.shape_cast %56 : vector<128xf32> to vector<1x128xf32>
    tpu.vector_store %arg3[%57, %c0_12], %60 {strides = array<i32>} : memref<8x128xf32, #tpu.memory_space<vmem>>, vector<1x128xf32>,
    %c5_i32 = arith.constant 5 : i32
    %61 = arith.addi %0, %c5_i32 : i32
    %62 = arith.index_cast %61 : i32 to index
    %63 = memref.load %arg1[%62] : memref<16xi32, #tpu.memory_space<smem>>
    %64 = arith.index_cast %63 : i32 to index
    %c0_13 = arith.constant 0 : index
    %65 = vector.load %arg2[%64, %c0_13] : memref<256x128xf32, #tpu.memory_space<vmem>>, vector<1x128xf32>
    %66 = vector.shape_cast %65 : vector<1x128xf32> to vector<128xf32>
    %cst_14 = arith.constant 11.3137083 : f32
    %67 = vector.broadcast %cst_14 : f32 to vector<128xf32>
    %68 = arith.mulf %66, %67 : vector<128xf32>
    %69 = arith.index_cast %c5_i32 : i32 to index
    %c0_15 = arith.constant 0 : index
    %70 = vector.load %arg3[%69, %c0_15] : memref<8x128xf32, #tpu.memory_space<vmem>>, vector<1x128xf32>
    %71 = vector.shape_cast %70 : vector<1x128xf32> to vector<128xf32>
    %72 = vector.shape_cast %68 : vector<128xf32> to vector<1x128xf32>
    tpu.vector_store %arg3[%69, %c0_15], %72 {strides = array<i32>} : memref<8x128xf32, #tpu.memory_space<vmem>>, vector<1x128xf32>,
    %c6_i32 = arith.constant 6 : i32
    %73 = arith.addi %0, %c6_i32 : i32
    %74 = arith.index_cast %73 : i32 to index
    %75 = memref.load %arg1[%74] : memref<16xi32, #tpu.memory_space<smem>>
    %76 = arith.index_cast %75 : i32 to index
    %c0_16 = arith.constant 0 : index
    %77 = vector.load %arg2[%76, %c0_16] : memref<256x128xf32, #tpu.memory_space<vmem>>, vector<1x128xf32>
    %78 = vector.shape_cast %77 : vector<1x128xf32> to vector<128xf32>
    %cst_17 = arith.constant 11.3137083 : f32
    %79 = vector.broadcast %cst_17 : f32 to vector<128xf32>
    %80 = arith.mulf %78, %79 : vector<128xf32>
    %81 = arith.index_cast %c6_i32 : i32 to index
    %c0_18 = arith.constant 0 : index
    %82 = vector.load %arg3[%81, %c0_18] : memref<8x128xf32, #tpu.memory_space<vmem>>, vector<1x128xf32>
    %83 = vector.shape_cast %82 : vector<1x128xf32> to vector<128xf32>
    %84 = vector.shape_cast %80 : vector<128xf32> to vector<1x128xf32>
    tpu.vector_store %arg3[%81, %c0_18], %84 {strides = array<i32>} : memref<8x128xf32, #tpu.memory_space<vmem>>, vector<1x128xf32>,
    %c7_i32 = arith.constant 7 : i32
    %85 = arith.addi %0, %c7_i32 : i32
    %86 = arith.index_cast %85 : i32 to index
    %87 = memref.load %arg1[%86] : memref<16xi32, #tpu.memory_space<smem>>
    %88 = arith.index_cast %87 : i32 to index
    %c0_19 = arith.constant 0 : index
    %89 = vector.load %arg2[%88, %c0_19] : memref<256x128xf32, #tpu.memory_space<vmem>>, vector<1x128xf32>
    %90 = vector.shape_cast %89 : vector<1x128xf32> to vector<128xf32>
    %cst_20 = arith.constant 11.3137083 : f32
    %91 = vector.broadcast %cst_20 : f32 to vector<128xf32>
    %92 = arith.mulf %90, %91 : vector<128xf32>
    %93 = arith.index_cast %c7_i32 : i32 to index
    %c0_21 = arith.constant 0 : index
    %94 = vector.load %arg3[%93, %c0_21] : memref<8x128xf32, #tpu.memory_space<vmem>>, vector<1x128xf32>
    %95 = vector.shape_cast %94 : vector<1x128xf32> to vector<128xf32>
    %96 = vector.shape_cast %92 : vector<128xf32> to vector<1x128xf32>
    tpu.vector_store %arg3[%93, %c0_21], %96 {strides = array<i32>} : memref<8x128xf32, #tpu.memory_space<vmem>>, vector<1x128xf32>,
    %c8_i32_22 = arith.constant 8 : i32
    return
  }
  func.func @transform_0(%arg0: i32, %arg1: memref<16xi32, #tpu.memory_space<smem>>) -> (i32, i32) {
    %c0_i32 = arith.constant 0 : i32
    %c0_i32_0 = arith.constant 0 : i32
    %c0_i32_1 = arith.constant 0 : i32
    return %c0_i32, %c0_i32_0 : i32, i32
  }
  func.func @transform_1(%arg0: i32, %arg1: memref<16xi32, #tpu.memory_space<smem>>) -> (i32, i32) {
    %c0_i32 = arith.constant 0 : i32
    %c0_i32_0 = arith.constant 0 : i32
    return %arg0, %c0_i32 : i32, i32
  }
}

</mosaic_0001>

<bundles_post_ra>
// kernel: embedding_lookup.1
= control target key start
LH: loop header
LB: loop body
LE: loop exit
PB: predicated region body
PF: predicated region fallthrough
CT: control target
= control target key end

     0   :  { %s428_s12 = smov [#allocation3]   ;;  %s569_s0 = inlined_call_operand.vmem [shape: s32[16], index: 0, kind: input, shape index: {}]   ;;  %s570_s1 = inlined_call_operand.hbm [shape: f32[256,128], index: 1, kind: input, shape index: {}]   ;;  %s571_s2 = inlined_call_operand.hbm [shape: f32[16,128], index: 2, kind: output, shape index: {}]  }
   0x1   :  { %s8_s11 = sshll.u32 %s569_s0, 4  ;;  %s9_s11 = int_to_ptr.vmem [resolvable:$true] %s8_s11 }
   0x2   :  { %11 = dma.vmem_to_smem %s9_s11, 16, %s428_s12, [#allocation2] }
   0x3   :  { %402 = dma.done.wait [#allocation2], 16 }
   0x4   :  { %403 = vsyncadd [#allocation2], 4294967280 }
   0x5   :  { %14 = sfence }
   0x6   :  { %15 = vsyncpa [#allocation5], 0 }
   0x7   :  { %16 = vsyncpa [#allocation6], 0 }
   0x8   :  { %18 = vsyncpa [#allocation6 + $0x1], 0  ;;  %s450_s13 = smov 0   ;;  %s452_s14 = smov 0  }
   0x9   :  { %s454_s15 = smov 0   ;;  %s456_s16 = smov 0  }
   0xa LB: > { %s471_s0 = sadd.s32 4294967295, %s426_s16   ;;  %s252_s17 = sadd.s32 4294967294, %s426_s16   ;;  %s426_s16 = sphi %s456_s16, %s577_s16   ;;  %s422_s15 = sphi %s454_s15, %s576_s15   ;;  %s418_s14 = sphi %s452_s14, %s575_s14   ;;  %s414_s13 = sphi %s450_s13, %s574_s13  }
   0xb   : > { %s475_s18 = sadd.s32 1, %s426_s16   ;;  %s52_s19 = sadd.s32 1, %s422_s15 }
   0xc   : > { %s49_s20 = ssub.s32 %s426_s16, %s475_s18  ;;  %p62_p0 = scmp.ne.s32.totalorder %s422_s15, %s418_s14 }
   0xd   : > { %p50_p1 = scmp.eq.s32.totalorder %s49_s20, 0  ;;  %p63_p2 = scmp.eq.s32.totalorder %s471_s0, 1 }
   0xe   : > { %p68_p3 = scmp.ne.s32.totalorder %s418_s14, %s414_s13  ;;  %p69_p4 = scmp.eq.s32.totalorder %s252_s17, 1 }
   0xf   : > { %s486_s21 = scalar_select %p50_p1, %s422_s15, %s52_s19  }
  0x10   : > { %p488_p5 = por %p63_p2, %p62_p0  ;;  %p492_p6 = por %p69_p4, %p68_p3 }
  0x11   : > { %p253_p7 = scmp.ge.s32.totalorder %s426_s16, 1  ;;  %p76_p8 = scmp.lt.s32.totalorder %s426_s16, 3 }
  0x12   : > { %p277_p9 = scmp.eq.s32.totalorder %s471_s0, 0  ;;  %s87_s26 = sshll.u32 %s570_s1, 4  ;;  %s88_s26 = int_to_ptr.hbm [resolvable:$true] %s87_s26 }
  0x13   : > { %p77_p10 = pnand %p253_p7, %p76_p8  ;;  %s429_s27 = smov [#allocation4]  }
  0x14   : > { %s89_s28 = sshll.u32 %s429_s27, 4  ;;  %s430_s29 = smov 128   ;;  %s90_s28 = int_to_ptr.vmem [resolvable:$true] %s89_s28 }
  0x15   : > { %p269_p11 = pneg %p77_p10  ;;  %s431_s30 = smov 8  }
  0x16   : > { %105 = sbr.rel (%p77_p10) target bundleno = 58 (0x3a), region = 24 }
  0x17   : > { %p270_p12 = pnand %p277_p9, %p269_p11 }
  0x19   : > { %272 = dma.hbm_to_vmem [thread:$0]  (!%p270_p12), %s88_s26, 4096, %s90_s28, [#allocation5], %s430_s29, %s430_s29, %s431_s30  }
  0x1b   : > { %405 = dma.done.wait (%p277_p9), [#allocation5], 4096  }
  0x1c   : > { %407 = vsyncadd (%p277_p9), [#allocation5], 4294963200  ;;  %s118_s3 = sand.u32 1, %s418_s14   ;;  %s510_s4 = sshll.u32 %s471_s0, 3 }
  0x1d   : > { %s257_s5 = sshll.u32 %s118_s3, 3  ;;  %s122_s6 = sld [smem:[#allocation3 + %s510_s4]] }
  0x1e   : > { %s127_s7 = sadd.s32 1, %s510_s4  ;;  %s133_s8 = sadd.s32 2, %s510_s4 }
  0x1f   : > { %s128_s9 = sld [smem:[#allocation3 + %s127_s7]]  ;;  %s139_s10 = sadd.s32 3, %s510_s4 }
  0x20   : > { %s134_s11 = sld [smem:[#allocation3 + %s133_s8]]  ;;  %s145_s12 = sadd.s32 4, %s510_s4 }
  0x21   : > { %s140_s17 = sld [smem:[#allocation3 + %s139_s10]]  ;;  %s151_s0 = sadd.s32 5, %s510_s4 }
  0x22   : > { %s146_s19 = sld [smem:[#allocation3 + %s145_s12]]  ;;  %s157_s25 = sadd.s32 6, %s510_s4 }
  0x23   : > { %s123_s20 = scalar_lea.vmem [#allocation4], %s122_s6  ;;  %s152_s24 = sld [smem:[#allocation3 + %s151_s0]] }
  0x24   : > { %v124_v0 = vld [vmem:[%s123_s20] sm:$0x1]  ;;  %s158_s26 = sld [smem:[#allocation3 + %s157_s25]]  ;;  %s163_s27 = sadd.s32 7, %s510_s4 }
  0x25   : > { %v125_v1 = vmul.f32 11.313708, %v124_v0  ;;  %s522_s28 = sld [smem:[#allocation3 + %s163_s27]]  ;;  %s524_s29 = scalar_lea.vmem [#allocation7], %s257_s5 }
  0x26   : > { %s129_s30 = scalar_lea.vmem [#allocation4], %s128_s9  ;;  %s135_s6 = scalar_lea.vmem [#allocation4], %s134_s11 }
  0x27   : > { %126 = vst [vmem:[%s524_s29] sm:$0x1] %v125_v1  ;;  %v130_v2 = vld [vmem:[%s129_s30] sm:$0x1]  ;;  %s141_s7 = scalar_lea.vmem [#allocation4], %s140_s17  ;;  %s182_s8 = sshll.u32 %s524_s29, 4  ;;  %s183_s8 = int_to_ptr.vmem [resolvable:$true] %s182_s8 }
  0x28   : > { %v131_v3 = vmul.f32 11.313708, %v130_v2  ;;  %v136_v4 = vld [vmem:[%s135_s6] sm:$0x1]  ;;  %s147_s5 = scalar_lea.vmem [#allocation4], %s146_s19  ;;  %s180_s9 = scalar_lea.hbm %s571_s2, %s510_s4 }
  0x29   : > { %v137_v5 = vmul.f32 11.313708, %v136_v4  ;;  %v142_v6 = vld [vmem:[%s141_s7] sm:$0x1]  ;;  %s153_s11 = scalar_lea.vmem [#allocation4], %s152_s24  ;;  %s184_s0 = sshll.u32 %s180_s9, 4  ;;  %s185_s0 = int_to_ptr.hbm [resolvable:$true] %s184_s0 }
  0x2a   : > { %132 = vst [vmem:[%s524_s29 + $0x1] sm:$0x1] %v131_v3  ;;  %v143_v7 = vmul.f32 11.313708, %v142_v6  ;;  %v148_v8 = vld [vmem:[%s147_s5] sm:$0x1] }
  0x2b   : > { %138 = vst [vmem:[%s524_s29 + $0x2] sm:$0x1] %v137_v5  ;;  %v149_v9 = vmul.f32 11.313708, %v148_v8  ;;  %v154_v10 = vld [vmem:[%s153_s11] sm:$0x1] }
  0x2c   : > { %144 = vst [vmem:[%s524_s29 + $0x3] sm:$0x1] %v143_v7  ;;  %s159_s17 = scalar_lea.vmem [#allocation4], %s158_s26  ;;  %v155_v12 = vmul.f32 11.313708, %v154_v10  ;;  %s165_s19 = scalar_lea.vmem [#allocation4], %s522_s28 }
  0x2d   : > { %v160_v11 = vld [vmem:[%s159_s17] sm:$0x1]  ;;  %150 = vst [vmem:[%s524_s29 + $0x4] sm:$0x1] %v149_v9  ;;  %s170_s4 = scalar_lea.sflag [#allocation6], %s118_s3  ;;  %s372_s20 = sshra.s32 %s185_s0, 4  ;;  %s373_s20 = int_to_ptr.hbm [resolvable:$true] %s372_s20 }
  0x2e   : > { %v161_v13 = vmul.f32 11.313708, %v160_v11  ;;  %156 = vst [vmem:[%s524_s29 + $0x5] sm:$0x1] %v155_v12  ;;  %v166_v14 = vld [vmem:[%s165_s19] sm:$0x1]  ;;  %p379_p2 = scmp.lt.s32.totalorder %s373_s20, %s571_s2 }
  0x2f   : > { %v167_v15 = vmul.f32 11.313708, %v166_v14  ;;  %s374_s24 = scalar_lea.hbm %s373_s20, 8  ;;  %s378_s27 = scalar_lea.hbm %s571_s2, 16 }
  0x30   : > { %162 = vst [vmem:[%s524_s29 + $0x6] sm:$0x1] %v161_v13  ;;  %p375_p13 = scmp.ne.s32.totalorder %s373_s20, %s374_s24  ;;  %p380_p3 = scmp.lt.s32.totalorder %s378_s27, %s374_s24 }
  0x31   : > { %168 = vst [vmem:[%s524_s29 + $0x7] sm:$0x1] %v167_v15 }
  0x32   : > { %p376_p0 = pnand %p375_p13, %p488_p5  ;;  %p381_p4 = por %p380_p3, %p379_p2 }
  0x34   : > { %p377_p1 = pneg %p376_p0 }
  0x36   : > { %p382_p7 = pnand %p381_p4, %p377_p1 }
  0x38   : > { %385 = shalt.err (!%p382_p7)
}
  0x39   : > { %267 = dma.vmem_to_hbm [thread:$0]  (%p488_p5), %s183_s8, 128, %s185_s0, %s170_s4  }
  0x3a PF: > { %p279_p8 = scmp.ge.s32.totalorder %s426_s16, 2  ;;  %s196_s3 = sand.u32 1, %s414_s13  }
  0x3b   : > { %s197_s29 = scalar_lea.sflag [#allocation6], %s196_s3 }
  0x3c   : > { %p274_p9 = pnand %p279_p8, %p492_p6 }
  0x3e   : > { %p275_p10 = pneg %p274_p9 }
  0x40   : > { %409 = dma.done.wait (%p275_p10), %s197_s29, 128  }
  0x41   : > { %411 = vsyncadd (%p275_p10), %s197_s29, 4294967168  ;;  %p21_p11 = scmp.ge.s32.totalorder %s475_s18, 4   ;;  %s574_s13 = smov %s418_s14 }
  0x42   : > { %s575_s14 = smov %s422_s15  ;;  %s576_s15 = smov %s486_s21 }
  0x43   : > { %s577_s16 = smov %s475_s18  ;;  %23 = sbr.rel (!%p21_p11) target bundleno = 10 (0xa), region = 69 }
  0x48   :  { %203 = vsyncpa [#allocation5], 1 }
  0x49   :  { %205 = vsyncpa [#allocation5 + $0x1], 1 }
  0x4a   :  { %206 = vsyncpa [#allocation6], 1 }
  0x4b   :  { %208 = vsyncpa [#allocation6 + $0x1], 1 }

</bundles_post_ra>
